<compile_context>
chip_gen: v6e
topology: v6e:2x2x1
jax: 0.10.0
libtpu: 0.0.40
codegen_flags: <defaults>
</compile_context>

<pallas_src>
import functools

import jax
import jax.numpy as jnp
import numpy as np
from jax.experimental import pallas as pl
from jax.experimental.pallas import tpu as pltpu

_IN_F, _HID, _OUT_F = 6, 10, 5


def _mlp_kernel(x_ref, w1_ref, b1_ref, w2_ref, b2_ref, o_ref):
    # x: [6, TB] bf16 | w1: [10, 6] bf16 | b1: [10, 1] f32
    # w2: [5, 10] bf16 | b2: [5, 1]  f32 | o: [5, TB] out_dtype
    h = jnp.dot(w1_ref[...], x_ref[...], preferred_element_type=jnp.float32)
    h = jnp.maximum(h + b1_ref[...], 0.0)                    # bias + ReLU in f32
    y = jnp.dot(w2_ref[...], h.astype(jnp.bfloat16),         # single bf16 MXU pass
                preferred_element_type=jnp.float32)
    o_ref[...] = (y + b2_ref[...]).astype(o_ref.dtype)


def prepare_params(w1, b1, w2, b2):
    """One-time conversion of PyTorch-convention params into kernel layout.

    w1: [10, 6], b1: [10], w2: [5, 10], b2: [5]  (out_features first).
    """
    return dict(
        w1=jnp.asarray(w1, jnp.bfloat16),                  # [10, 6]
        b1=jnp.asarray(b1, jnp.float32).reshape(-1, 1),    # [10, 1]
        w2=jnp.asarray(w2, jnp.bfloat16),                  # [5, 10]
        b2=jnp.asarray(b2, jnp.float32).reshape(-1, 1),    # [5, 1]
    )


def _round_up(n, m):
    return ((n + m - 1) // m) * m


def _pick_tile(b, block_b):
    """Choose (tile, padded_batch): tile % 128 == 0, padded_batch % tile == 0,
    and >= 2 grid steps whenever b >= 256 (v7x megacore sharding)."""
    cap = max(128, _round_up(int(block_b), 128))
    b128 = max(128, _round_up(int(b), 128))
    n = max(1, -(-b128 // cap))
    if n == 1 and b128 >= 256:
        n = 2
    tb = _round_up(-(-b128 // n), 128)
    return tb, n * tb


@functools.partial(jax.jit, static_argnames=("block_b", "out_dtype"))
def _forward_t(x_t, w1, b1, w2, b2, *, block_b, out_dtype):
    """x_t: [6, Bp] bf16 with Bp % block_b == 0.  Returns y_t: [5, Bp]."""
    in_f, bp = x_t.shape
    hid, out_f = w1.shape[0], w2.shape[0]
    grid = (bp // block_b,)
    out_bytes = jnp.dtype(out_dtype).itemsize
    cost = pl.CostEstimate(
        flops=2 * (in_f * hid + hid * out_f) * bp,
        transcendentals=0,
        bytes_accessed=(bp * in_f * 2                       # x (bf16)
                        + bp * out_f * out_bytes            # y
                        + (hid * in_f + out_f * hid) * 2    # weights (bf16)
                        + (hid + out_f) * 4),               # biases (f32)
    )
    return pl.pallas_call(
        _mlp_kernel,
        out_shape=jax.ShapeDtypeStruct((out_f, bp), out_dtype),
        grid=grid,
        in_specs=[
            pl.BlockSpec((in_f, block_b), lambda i: (0, i)),   # x tile (lane-dense)
            pl.BlockSpec((hid, in_f), lambda i: (0, 0)),       # W1 (grid-invariant)
            pl.BlockSpec((hid, 1), lambda i: (0, 0)),          # b1
            pl.BlockSpec((out_f, hid), lambda i: (0, 0)),      # W2
            pl.BlockSpec((out_f, 1), lambda i: (0, 0)),        # b2
        ],
        out_specs=pl.BlockSpec((out_f, block_b), lambda i: (0, i)),
        compiler_params=pltpu.CompilerParams(
            dimension_semantics=("parallel",),   # v7x: shard batch over both TCs
        ),
        cost_estimate=cost,
    )(x_t, w1, b1, w2, b2)


def seek_brain_forward_t(x_t, params, *, block_b=65536, out_dtype=jnp.float32):
    """Native-layout entry point (no transposes): x_t [6, B] -> y_t [5, B].

    Keep the population persistently in [6, B] bf16 (and consume [5, B]
    downstream) to avoid all wrapper-side HBM round trips.
    """
    b = x_t.shape[1]
    tb, bp = _pick_tile(b, block_b)
    x_t = jnp.asarray(x_t, jnp.bfloat16)
    if bp != b:
        x_t = jnp.pad(x_t, ((0, 0), (0, bp - b)))
    y_t = _forward_t(x_t, params["w1"], params["b1"], params["w2"],
                     params["b2"], block_b=tb, out_dtype=out_dtype)
    return y_t[:, :b]


def seek_brain_forward(x, params, *, block_b=65536, out_dtype=jnp.float32):
    """PyTorch-layout wrapper: x [B, 6] -> y [B, 5] (matches SeekBrain.forward).

    Note: the transposes here are pure layout plumbing; prefer
    seek_brain_forward_t in the hot evolife loop.
    """
    y_t = seek_brain_forward_t(jnp.asarray(x, jnp.bfloat16).T, params,
                               block_b=block_b, out_dtype=out_dtype)
    return y_t.T


def _torch_linear_init(key, out_features, in_features):
    """Deterministic init mimicking nn.Linear (U[-1/sqrt(fan_in), 1/sqrt(fan_in)])."""
    kw, kb = jax.random.split(key)
    bound = 1.0 / np.sqrt(in_features)
    w = jax.random.uniform(kw, (out_features, in_features), jnp.float32,
                           minval=-bound, maxval=bound)
    b = jax.random.uniform(kb, (out_features,), jnp.float32,
                           minval=-bound, maxval=bound)
    return w, b


def _ref_forward(x, w1, b1, w2, b2):
    """Numpy f32 reference of the kernel math (bf16 quantization of x/W1/h/W2)."""
    bf = lambda a: np.asarray(jnp.asarray(a, jnp.bfloat16).astype(jnp.float32))
    h = np.maximum(bf(x) @ bf(w1).T + np.asarray(b1, np.float32), 0.0)
    return bf(h) @ bf(w2).T + np.asarray(b2, np.float32)


if __name__ == "__main__":
    key = jax.random.PRNGKey(0)
    k_x1, k_x2, k_fc1, k_fc2 = jax.random.split(key, 4)

    w1, b1 = _torch_linear_init(k_fc1, _HID, _IN_F)    # fc1: Linear(6, 10)
    w2, b2 = _torch_linear_init(k_fc2, _OUT_F, _HID)   # fc2: Linear(10, 5)
    params = prepare_params(w1, b1, w2, b2)

    # Small batch, PyTorch layout, f32 output (single 128-lane tile path).
    x_small = jax.random.normal(k_x1, (8, _IN_F), jnp.float32)
    out_small = jax.block_until_ready(seek_brain_forward(x_small, params))
    np.testing.assert_allclose(
        np.asarray(out_small, np.float32),
        _ref_forward(x_small, w1, b1, w2, b2), rtol=1e-3, atol=1e-3)

    # Larger batch, native [6, B] layout, bf16 output, small block_b so the
    # multi-tile grid + padding/slicing path is exercised deterministically.
    x_big = jax.random.normal(k_x2, (300, _IN_F), jnp.float32)
    out_big_t = jax.block_until_ready(
        seek_brain_forward_t(x_big.T, params, block_b=256,
                             out_dtype=jnp.bfloat16))
    np.testing.assert_allclose(
        np.asarray(out_big_t.T, np.float32),
        _ref_forward(x_big, w1, b1, w2, b2), rtol=2e-2, atol=2e-2)

    print("KERNEL_OK")
</pallas_src>

<mosaic_0001>
module attributes {stable_mosaic.version = 11 : i64} {
  func.func @_mlp_kernel(%arg0: i32, %arg1: memref<6x128xbf16, #tpu.memory_space<vmem>>, %arg2: memref<10x6xbf16, #tpu.memory_space<vmem>>, %arg3: memref<10x1xf32, #tpu.memory_space<vmem>>, %arg4: memref<5x10xbf16, #tpu.memory_space<vmem>>, %arg5: memref<5x1xf32, #tpu.memory_space<vmem>>, %arg6: memref<5x128xf32, #tpu.memory_space<vmem>>) attributes {dimension_semantics = [#tpu.dimension_semantics<parallel>], iteration_bounds = array<i64: 1>, scalar_prefetch = 0 : i64, scratch_operands = 0 : i64, tpu.core_type = #tpu.core_type<tc>, window_params = [{transform_indices = @transform_0, window_bounds = array<i64: 6, 128>}, {pipeline_mode = #tpu.pipeline_mode<synchronous>, transform_indices = @transform_1, window_bounds = array<i64: 10, 6>}, {pipeline_mode = #tpu.pipeline_mode<synchronous>, transform_indices = @transform_2, window_bounds = array<i64: 10, 1>}, {pipeline_mode = #tpu.pipeline_mode<synchronous>, transform_indices = @transform_3, window_bounds = array<i64: 5, 10>}, {pipeline_mode = #tpu.pipeline_mode<synchronous>, transform_indices = @transform_4, window_bounds = array<i64: 5, 1>}, {transform_indices = @transform_5, window_bounds = array<i64: 5, 128>}]} {
    %c0 = arith.constant 0 : index
    %c0_0 = arith.constant 0 : index
    %0 = vector.load %arg2[%c0, %c0_0] : memref<10x6xbf16, #tpu.memory_space<vmem>>, vector<10x6xbf16>
    %c0_1 = arith.constant 0 : index
    %c0_2 = arith.constant 0 : index
    %1 = vector.load %arg1[%c0_1, %c0_2] : memref<6x128xbf16, #tpu.memory_space<vmem>>, vector<6x128xbf16>
    %cst = arith.constant dense<0.000000e+00> : vector<10x128xf32>
    %2 = tpu.matmul %0, %1, %cst {dimension_numbers = #tpu.dot_dimension_numbers<[1], [0], [0], [1], [0, 0, 1, 1], [], []>} : vector<10x6xbf16>, vector<6x128xbf16>, vector<10x128xf32> -> vector<10x128xf32>
    %c0_3 = arith.constant 0 : index
    %c0_4 = arith.constant 0 : index
    %3 = vector.load %arg3[%c0_3, %c0_4] : memref<10x1xf32, #tpu.memory_space<vmem>>, vector<10x1xf32>
    %4 = vector.broadcast %3 : vector<10x1xf32> to vector<10x128xf32>
    %5 = arith.addf %2, %4 : vector<10x128xf32>
    %cst_5 = arith.constant 0.000000e+00 : f32
    %6 = vector.broadcast %cst_5 : f32 to vector<10x128xf32>
    %7 = arith.maximumf %5, %6 : vector<10x128xf32>
    %c0_6 = arith.constant 0 : index
    %c0_7 = arith.constant 0 : index
    %8 = vector.load %arg4[%c0_6, %c0_7] : memref<5x10xbf16, #tpu.memory_space<vmem>>, vector<5x10xbf16>
    %9 = arith.truncf %7 : vector<10x128xf32> to vector<10x128xbf16>
    %cst_8 = arith.constant dense<0.000000e+00> : vector<5x128xf32>
    %10 = tpu.matmul %8, %9, %cst_8 {dimension_numbers = #tpu.dot_dimension_numbers<[1], [0], [0], [1], [0, 0, 1, 1], [], []>} : vector<5x10xbf16>, vector<10x128xbf16>, vector<5x128xf32> -> vector<5x128xf32>
    %c0_9 = arith.constant 0 : index
    %c0_10 = arith.constant 0 : index
    %11 = vector.load %arg5[%c0_9, %c0_10] : memref<5x1xf32, #tpu.memory_space<vmem>>, vector<5x1xf32>
    %12 = vector.broadcast %11 : vector<5x1xf32> to vector<5x128xf32>
    %13 = arith.addf %10, %12 : vector<5x128xf32>
    %c0_11 = arith.constant 0 : index
    %c0_12 = arith.constant 0 : index
    %14 = vector.load %arg6[%c0_11, %c0_12] : memref<5x128xf32, #tpu.memory_space<vmem>>, vector<5x128xf32>
    tpu.vector_store %arg6[%c0_11, %c0_12], %13 {strides = array<i32>} : memref<5x128xf32, #tpu.memory_space<vmem>>, vector<5x128xf32>,
    return
  }
  func.func @transform_0(%arg0: i32) -> (i32, i32) {
    %c0_i32 = arith.constant 0 : i32
    %c0_i32_0 = arith.constant 0 : i32
    return %c0_i32, %arg0 : i32, i32
  }
  func.func @transform_1(%arg0: i32) -> (i32, i32) {
    %c0_i32 = arith.constant 0 : i32
    %c0_i32_0 = arith.constant 0 : i32
    %c0_i32_1 = arith.constant 0 : i32
    return %c0_i32, %c0_i32_0 : i32, i32
  }
  func.func @transform_2(%arg0: i32) -> (i32, i32) {
    %c0_i32 = arith.constant 0 : i32
    %c0_i32_0 = arith.constant 0 : i32
    %c0_i32_1 = arith.constant 0 : i32
    return %c0_i32, %c0_i32_0 : i32, i32
  }
  func.func @transform_3(%arg0: i32) -> (i32, i32) {
    %c0_i32 = arith.constant 0 : i32
    %c0_i32_0 = arith.constant 0 : i32
    %c0_i32_1 = arith.constant 0 : i32
    return %c0_i32, %c0_i32_0 : i32, i32
  }
  func.func @transform_4(%arg0: i32) -> (i32, i32) {
    %c0_i32 = arith.constant 0 : i32
    %c0_i32_0 = arith.constant 0 : i32
    %c0_i32_1 = arith.constant 0 : i32
    return %c0_i32, %c0_i32_0 : i32, i32
  }
  func.func @transform_5(%arg0: i32) -> (i32, i32) {
    %c0_i32 = arith.constant 0 : i32
    %c0_i32_0 = arith.constant 0 : i32
    return %c0_i32, %arg0 : i32, i32
  }
}

</mosaic_0001>

<bundles_post_ra>
// kernel: _forward_t.1
= control target key start
LH: loop header
LB: loop body
LE: loop exit
PB: predicated region body
PF: predicated region fallthrough
CT: control target
= control target key end

     0   :  { %vm46_vm0 = vcmask 1042432   ;;  %v212_v1 = vmov 0.0   ;;  %vm213_vm1 = vmmov 0   ;;  %vm42_vm2 = vcmask 48128   ;;  %s267_s0 = inlined_call_operand.vmem [shape: bf16[6,128], index: 0, kind: input, shape index: {}]   ;;  %s268_s1 = inlined_call_operand.vmem [shape: bf16[10,6], index: 1, kind: input, shape index: {}]   ;;  %s269_s2 = inlined_call_operand.vmem [shape: f32[10,1], index: 2, kind: input, shape index: {}]   ;;  %s270_s3 = inlined_call_operand.vmem [shape: bf16[5,10], index: 3, kind: input, shape index: {}]   ;;  %s271_s4 = inlined_call_operand.vmem [shape: f32[5,1], index: 4, kind: input, shape index: {}]   ;;  %s272_s5 = inlined_call_operand.hbm [shape: f32[5,128], index: 5, kind: output, shape index: {}]  }
   0x1   :  { %v24_v0 = vld [vmem:[%s267_s0] sm:$0x7]  ;;  %171 = vmatprep.subr.bf16.mxu0 %v212_v1  ;;  %173 = vmatprep.mubr.msk.bf16.mxu0 %vm213_vm1, %v212_v1  ;;  %v214_v4 = vmov 0  }
   0x2   :  { %v48_v2 = vsel %vm46_vm0, %v24_v0, 0  ;;  %v189_v3 = vld [vmem:[%s268_s1] sm:$0x1f]   ;;  %187 = vset.pattern.permute.xlu0 %v214_v4  ;;  %177 = vmatprep.subr.bf16.mxu1 %v212_v1 }
   0x3   :  { %172 = vmatpush3.bf16.msra.mxu0 %v48_v2  ;;  %v25_v5 = vld [vmem:[%s269_s2] sm:$0xff] }
   0x4   :  { %29 = vperm.xlu0 %187, %v25_v5  }
   0x5   :  { %10 = vsyncpa [#allocation3], 0  ;;  %v26_v6 = vld [vmem:[%s269_s2 + $0x8] sm:$0x3]  ;;  %179 = vmatprep.mubr.msk.bf16.mxu1 %vm213_vm1, %v212_v1  ;;  %188 = vset.pattern.permute.xlu1 %v214_v4  ;;  %v95_v7 = vld [vmem:[%s271_s4] sm:$0x1f] }
   0x6   :  { %174 = vmatmul.mubr.msk.bf16.vlgmr.msra.gmra.mxu0 %vm42_vm2, %v189_v3  ;;  %98 = vperm.xlu1 %188, %v95_v7   ;;  %vm105_vm3 = vcmask 1044480   ;;  %v93_v20 = vld [vmem:[%s270_s3] sm:$0x7]  ;;  %vm101_vm4 = vcmask 80896   ;;  %s215_s4 = smov [#allocation2]  }
   0x7   :  { %s156_s27 = sshll.u32 %s215_s4, 4  ;;  %s157_s27 = int_to_ptr.vmem [resolvable:$true] %s156_s27 }
   0x8   :  { %34 = vperm.xlu0 %187, %v26_v6   ;;  %s190_s28 = scalar_lea.vmem %s157_s27, 128  ;;  %p195_p1 = scmp.lt.s32.totalorder %s157_s27, %s157_s27 }
   0x9   :  { %p191_p0 = scmp.ne.s32.totalorder %s157_s27, %s190_s28  ;;  %p196_p2 = scmp.lt.s32.totalorder %s190_s28, %s190_s28 }
   0xb   :  { %p197_p3 = por %p196_p2, %p195_p1 }
   0xd   :  { %p198_p4 = pnand %p197_p3, %p191_p0 }
  0x7f   :  { %v30_v8 = vpop.permute.xlu0 %29 }
  0x81   :  { %v99_v21 = vpop.permute.xlu1 %98 }
  0x83   :  { %v35_v12 = vpop.permute.xlu0 %34 }
  0xc6   :  { %v84_v9 = vpop.f32.mrf.mxu0 }
  0xc7   :  { %v85_v11 = vadd.f32 %v84_v9, %v30_v8 }
  0xc8   :  { %v175_v10 = vpop.f32.mrf.mxu0 }
  0xc9   :  { %v91_v16 = vmax.f32 %v85_v11, 0.0 }
  0xca   :  { %v87_v13 = vpop.f32.mrf.mxu0 }
  0xcb   :  { %v88_v14 = vadd.f32 %v87_v13, %v35_v12 }
  0xcc   :  { %v176_v15 = vpop.f32.mrf.mxu0 }
  0xcd   :  { %v92_v17 = vmax.f32 %v88_v14, 0.0 }
  0xcf   :  { %v94_v18 = vpack.c.bf16 %v92_v17, %v91_v16 }
  0xd1   :  { %v107_v19 = vsel %vm105_vm3, %v94_v18, 0 }
  0xd2   :  { %178 = vmatpush3.bf16.msra.mxu1 %v107_v19 }
  0xd5   :  { %180 = vmatmul.mubr.msk.bf16.vlgmr.msra.gmra.mxu1 %vm101_vm4, %v93_v20 }
 0x195   :  { %v143_v22 = vpop.f32.mrf.mxu1 }
 0x196   :  { %v144_v23 = vadd.f32 %v143_v22, %v99_v21 }
 0x197   :  { %v181_v24 = vpop.f32.mrf.mxu1 }
 0x198   :  { %149 = vst [vmem:[#allocation2] sm:$0x1f] %v144_v23 }
 0x199   :  { %v146_v25 = vpop.f32.mrf.mxu1 }
 0x19a   :  { %201 = shalt.err (!%p198_p4)
}
 0x19b   :  { %159 = dma.vmem_to_hbm [thread:$0]  %s157_s27, 128, %s272_s5, [#allocation3]   ;;  %v182_v26 = vpop.f32.mrf.mxu1 }
 0x19c   :  { %210 = dma.done.wait [#allocation3], 128  }
 0x19d   :  { %211 = vsyncadd [#allocation3], 4294967168 }
 0x19e   :  { %163 = vsyncpa [#allocation3], 1 }

</bundles_post_ra>
